<compile_context>
chip_gen: v7x
topology: tpu7x:2x2x1
jax: 0.10.0
libtpu: 0.0.40
codegen_flags: <defaults>
</compile_context>

<pallas_src>
import functools

import jax
import jax.numpy as jnp
from jax.experimental import pallas as pl
from jax.experimental.pallas import tpu as pltpu


def _cdiv(a, b):
    return -(-a // b)


def _round_up(a, m):
    return _cdiv(a, m) * m


def _smooth_l1_partial_kernel(lim_ref, tgt_ref, out_ref, part_ref, *, feat_block):
    # lim_ref:  (bb, 1)       int32  per-row valid flat-feature count (length * D)
    # tgt_ref:  (bb, fb)             flattened (time*feature) tile
    # out_ref:  (bb, fb)             flattened (time*feature) tile
    # part_ref: (1, 1, 1, 128) f32   partial sum of this grid block (in lane 0)
    tgt = tgt_ref[...]
    out = out_ref[...]
    if tgt.dtype != jnp.float32:
        tgt = tgt.astype(jnp.float32)
    if out.dtype != jnp.float32:
        out = out.astype(jnp.float32)

    diff = out - tgt
    ad = jnp.abs(diff)
    # SmoothL1 (beta = 1), select-free form:
    #   z = min(|d|, 1);  0.5*z^2 + (|d| - z)  ==  0.5*d^2 if |d|<1 else |d|-0.5
    z = jnp.minimum(ad, 1.0)
    elem = 0.5 * z * z + (ad - z)

    # Global flat-feature index of each lane in this tile.  Features of one
    # timestep are contiguous, so "t < length" <=> "flat_idx < length * D".
    # Ragged edge blocks (batch rows >= B, lanes >= F) hold undefined data;
    # their limits are 0 (padded) / <= F, and jnp.where is NaN/Inf-safe, so
    # every garbage element is masked to exactly 0.
    f0 = pl.program_id(1) * feat_block
    f_idx = jax.lax.broadcasted_iota(jnp.int32, elem.shape, dimension=1) + f0
    masked = jnp.where(f_idx < lim_ref[...], elem, 0.0)

    col = jnp.sum(masked, axis=0, keepdims=True)     # (1, fb)  sublane reduce
    tot = jnp.sum(col, axis=-1, keepdims=True)       # (1, 1)   lane reduce (XLU)
    lane = jax.lax.broadcasted_iota(jnp.int32, (1, 128), 1)
    part_ref[...] = jnp.where(lane == 0, tot, 0.0).reshape(1, 1, 1, 128)


def poses_loss_masking(target, output, length, epsilon=1e-5):
    """Pallas equivalent of PosesLossMasking.forward (f32 accumulation)."""
    B, T, D = target.shape
    F = T * D
    itemsize = jnp.dtype(target.dtype).itemsize
    align = {1: 32, 2: 16}.get(itemsize, 8)        # native sublane packing

    # Flatten [B, T, D] -> [B, T*D]; contiguous, so this reshape is free.
    tgt2 = target.reshape(B, F)
    out2 = output.reshape(B, F)

    # ---- tiling ----------------------------------------------------------
    block_budget = 6 * 1024 * 1024                 # bytes per streamed input block

    # Feature-axis tiling only if even a minimum-height (align-row) batch tile
    # is too wide for the budget (very long flattened sequences).
    if align * F * itemsize > block_budget:
        fb = max(128, (block_budget // (align * itemsize)) // 128 * 128)
        nf = _cdiv(F, fb)
        fb = _round_up(_cdiv(F, nf), 128)
        nf = _cdiv(F, fb)
    else:
        nf, fb = 1, F

    fb_vmem = _round_up(fb, 128)                   # lanes actually held in VMEM

    # Balanced batch tiling (avoid a tiny ragged last block).
    bb_max = max(align, (block_budget // (fb_vmem * itemsize)) // align * align)
    bb_max = min(bb_max, _round_up(B, align))
    nb = _cdiv(B, bb_max)
    bb = _round_up(_cdiv(B, nb), align)
    nb = _cdiv(B, bb)

    # v7x shards "parallel" grid axes across its 2 TensorCores: expose at least
    # 2 independent blocks when the problem allows (free on single-TC v5e/v6e).
    if nb * nf < 2:
        if B > align:
            bb = _round_up(_cdiv(B, 2), align)
            nb = _cdiv(B, bb)
        elif F >= 256 and nf == 1:
            fb = _round_up(_cdiv(F, 2), 128)
            nf = _cdiv(F, fb)
            fb_vmem = _round_up(fb, 128)

    # ---- per-row mask limits (tiny; the ONLY thing that gets padded) ------
    b_total = nb * bb
    limits = length.astype(jnp.int32) * jnp.int32(D)
    if b_total != B:
        limits = jnp.pad(limits, (0, b_total - B))   # padded rows -> limit 0
    limits = limits.reshape(b_total, 1)

    # ---- VMEM budget / scheduler hints ------------------------------------
    vmem_need = (
        2 * 2 * bb * fb_vmem * itemsize     # target + output, double-buffered
        + 2 * bb * 128 * 4                  # limits tile (lane-padded to 128)
        + 2 * 8 * 128 * 4                   # output tile (tile-padded)
    )
    vmem_limit = int(min(vmem_need + 8 * 1024 * 1024, 48 * 1024 * 1024))

    cost = pl.CostEstimate(
        flops=8 * B * F,
        transcendentals=0,
        bytes_accessed=2 * B * F * itemsize + b_total * 4 + nb * nf * 512,
    )

    kernel = functools.partial(_smooth_l1_partial_kernel, feat_block=fb)

    partials = pl.pallas_call(
        kernel,
        out_shape=jax.ShapeDtypeStruct((nb, nf, 1, 128), jnp.float32),
        grid=(nb, nf),
        in_specs=[
            pl.BlockSpec((bb, 1), lambda i, j: (i, 0)),      # limits
            pl.BlockSpec((bb, fb), lambda i, j: (i, j)),     # target
            pl.BlockSpec((bb, fb), lambda i, j: (i, j)),     # output
        ],
        out_specs=pl.BlockSpec((1, 1, 1, 128), lambda i, j: (i, j, 0, 0)),
        compiler_params=pltpu.CompilerParams(
            dimension_semantics=("parallel", "parallel"),
            vmem_limit_bytes=vmem_limit,
        ),
        cost_estimate=cost,
    )(limits, tgt2, out2)

    total = jnp.sum(partials)
    return (total + jnp.float32(epsilon)) / jnp.float32(B)


def _reference(target, output, length, epsilon=1e-5):
    """Pure-JAX reference mirroring the PyTorch module (f32 instead of f64)."""
    B, T, D = target.shape
    diff = output.astype(jnp.float32) - target.astype(jnp.float32)
    ad = jnp.abs(diff)
    elem = jnp.where(ad < 1.0, 0.5 * diff * diff, ad - 0.5)
    t_idx = jnp.arange(T)[None, :, None]
    mask = t_idx < length[:, None, None]
    total = jnp.sum(jnp.where(mask, elem, 0.0)) + epsilon
    return total / B


if __name__ == "__main__":
    key = jax.random.PRNGKey(0)
    k1, k2, k3 = jax.random.split(key, 3)

    # Small case (lane-aligned flat features). Exercises the feature-axis split
    # that guarantees >= 2 parallel blocks and the ragged batch edge block.
    B, T, D = 2, 8, 32
    target = jax.random.normal(k1, (B, T, D), dtype=jnp.float32) * 2.0
    output = jax.random.normal(k2, (B, T, D), dtype=jnp.float32) * 2.0
    length = jax.random.randint(k3, (B,), minval=1, maxval=T + 1, dtype=jnp.int32)

    loss = jax.block_until_ready(poses_loss_masking(target, output, length))
    ref = jax.block_until_ready(_reference(target, output, length))
    assert jnp.allclose(loss, ref, rtol=1e-4, atol=1e-4), (loss, ref)

    # Module-default feature_dim=99 (unaligned flat features, ragged F block).
    k4, k5, k6 = jax.random.split(k3, 3)
    B2, T2, D2 = 5, 7, 99
    target2 = jax.random.normal(k4, (B2, T2, D2), dtype=jnp.float32) * 2.0
    output2 = jax.random.normal(k5, (B2, T2, D2), dtype=jnp.float32) * 2.0
    length2 = jax.random.randint(k6, (B2,), minval=1, maxval=T2 + 1, dtype=jnp.int32)

    loss2 = jax.block_until_ready(poses_loss_masking(target2, output2, length2))
    ref2 = jax.block_until_ready(_reference(target2, output2, length2))
    assert jnp.allclose(loss2, ref2, rtol=1e-4, atol=1e-4), (loss2, ref2)

    print("KERNEL_OK")
</pallas_src>

<mosaic_0001>
module attributes {stable_mosaic.version = 11 : i64} {
  func.func @_smooth_l1_partial_kernel(%arg0: i32, %arg1: i32, %arg2: memref<8x1xi32, #tpu.memory_space<vmem>>, %arg3: memref<8x128xf32, #tpu.memory_space<vmem>>, %arg4: memref<8x128xf32, #tpu.memory_space<vmem>>, %arg5: memref<1x1x1x128xf32, #tpu.memory_space<vmem>>) attributes {dimension_semantics = [#tpu.dimension_semantics<parallel>, #tpu.dimension_semantics<parallel>], iteration_bounds = array<i64: 1, 2>, scalar_prefetch = 0 : i64, scratch_operands = 0 : i64, tpu.core_type = #tpu.core_type<tc>, window_params = [{transform_indices = @transform_0, window_bounds = array<i64: 8, 1>}, {transform_indices = @transform_1, window_bounds = array<i64: 8, 128>}, {transform_indices = @transform_2, window_bounds = array<i64: 8, 128>}, {transform_indices = @transform_3, window_bounds = array<i64: 1, 1, 1, 128>}]} {
    %c0 = arith.constant 0 : index
    %c0_0 = arith.constant 0 : index
    %0 = vector.load %arg3[%c0, %c0_0] : memref<8x128xf32, #tpu.memory_space<vmem>>, vector<8x128xf32>
    %c0_1 = arith.constant 0 : index
    %c0_2 = arith.constant 0 : index
    %1 = vector.load %arg4[%c0_1, %c0_2] : memref<8x128xf32, #tpu.memory_space<vmem>>, vector<8x128xf32>
    %2 = arith.subf %1, %0 : vector<8x128xf32>
    %3 = math.absf %2 : vector<8x128xf32>
    %cst = arith.constant 1.000000e+00 : f32
    %4 = vector.broadcast %cst : f32 to vector<8x128xf32>
    %5 = arith.minimumf %3, %4 : vector<8x128xf32>
    %cst_3 = arith.constant 5.000000e-01 : f32
    %6 = vector.broadcast %cst_3 : f32 to vector<8x128xf32>
    %7 = arith.mulf %6, %5 : vector<8x128xf32>
    %8 = arith.mulf %7, %5 : vector<8x128xf32>
    %9 = arith.subf %3, %5 : vector<8x128xf32>
    %10 = arith.addf %8, %9 : vector<8x128xf32>
    %c128_i32 = arith.constant 128 : i32
    %11 = arith.muli %arg1, %c128_i32 : i32
    %12 = tpu.iota {dimensions = array<i32: 1>} : vector<8x128xi32>
    %13 = vector.broadcast %11 : i32 to vector<8x128xi32>
    %14 = arith.addi %12, %13 : vector<8x128xi32>
    %c0_4 = arith.constant 0 : index
    %c0_5 = arith.constant 0 : index
    %15 = vector.load %arg2[%c0_4, %c0_5] : memref<8x1xi32, #tpu.memory_space<vmem>>, vector<8x1xi32>
    %16 = vector.broadcast %15 : vector<8x1xi32> to vector<8x128xi32>
    %17 = arith.cmpi slt, %14, %16 : vector<8x128xi32>
    %cst_6 = arith.constant 0.000000e+00 : f32
    %18 = vector.broadcast %cst_6 : f32 to vector<8x128xf32>
    %19 = arith.select %17, %10, %18 : vector<8x128xi1>, vector<8x128xf32>
    %cst_7 = arith.constant dense<0.000000e+00> : vector<128xf32>
    %20 = vector.multi_reduction <add>, %19, %cst_7 [0] : vector<8x128xf32> to vector<128xf32>
    %21 = vector.shape_cast %20 : vector<128xf32> to vector<1x128xf32>
    %cst_8 = arith.constant dense<0.000000e+00> : vector<1xf32>
    %22 = vector.multi_reduction <add>, %21, %cst_8 [1] : vector<1x128xf32> to vector<1xf32>
    %23 = vector.shape_cast %22 : vector<1xf32> to vector<1x1xf32>
    %24 = tpu.iota {dimensions = array<i32: 1>} : vector<1x128xi32>
    %c0_i32 = arith.constant 0 : i32
    %25 = vector.broadcast %c0_i32 : i32 to vector<1x128xi32>
    %26 = arith.cmpi eq, %24, %25 : vector<1x128xi32>
    %cst_9 = arith.constant 0.000000e+00 : f32
    %27 = vector.shape_cast %23 : vector<1x1xf32> to vector<1x1xf32>
    %28 = vector.broadcast %27 : vector<1x1xf32> to vector<1x128xf32>
    %29 = vector.broadcast %cst_9 : f32 to vector<1x128xf32>
    %30 = arith.select %26, %28, %29 : vector<1x128xi1>, vector<1x128xf32>
    %31 = vector.shape_cast %30 : vector<1x128xf32> to vector<1x1x1x128xf32>
    %c0_10 = arith.constant 0 : index
    %c0_11 = arith.constant 0 : index
    %c0_12 = arith.constant 0 : index
    %c0_13 = arith.constant 0 : index
    %32 = vector.load %arg5[%c0_10, %c0_11, %c0_12, %c0_13] : memref<1x1x1x128xf32, #tpu.memory_space<vmem>>, vector<1x1x1x128xf32>
    tpu.vector_store %arg5[%c0_10, %c0_11, %c0_12, %c0_13], %31 {strides = array<i32>} : memref<1x1x1x128xf32, #tpu.memory_space<vmem>>, vector<1x1x1x128xf32>,
    return
  }
  func.func @transform_0(%arg0: i32, %arg1: i32) -> (i32, i32) {
    %c0_i32 = arith.constant 0 : i32
    %c0_i32_0 = arith.constant 0 : i32
    return %arg0, %c0_i32 : i32, i32
  }
  func.func @transform_1(%arg0: i32, %arg1: i32) -> (i32, i32) {
    %c0_i32 = arith.constant 0 : i32
    return %arg0, %arg1 : i32, i32
  }
  func.func @transform_2(%arg0: i32, %arg1: i32) -> (i32, i32) {
    %c0_i32 = arith.constant 0 : i32
    return %arg0, %arg1 : i32, i32
  }
  func.func @transform_3(%arg0: i32, %arg1: i32) -> (i32, i32, i32, i32) {
    %c0_i32 = arith.constant 0 : i32
    %c0_i32_0 = arith.constant 0 : i32
    %c0_i32_1 = arith.constant 0 : i32
    return %arg0, %arg1, %c0_i32, %c0_i32_0 : i32, i32, i32, i32
  }
}

</mosaic_0001>

<bundles_post_ra>
// kernel: tpu_custom_call.1
= control target key start
LH: loop header
LB: loop body
LE: loop exit
PB: predicated region body
PF: predicated region fallthrough
CT: control target
= control target key end

     0   :  { %8 = vsyncpa [#allocation5], 0  ;;  %s953_s0 = inlined_call_operand.vmem [shape: s32[8,1], index: 0, kind: input, shape index: {}]   ;;  %s954_s1 = inlined_call_operand.vmem [shape: f32[2,256], index: 1, kind: input, shape index: {}]   ;;  %s955_s2 = inlined_call_operand.vmem [shape: f32[2,256], index: 2, kind: input, shape index: {}]   ;;  %s956_s3 = inlined_call_operand.hbm [shape: f32[1,2,1,128], index: 3, kind: output, shape index: {}]  }
   0x1   :  { %10 = vsyncpa [#allocation5 + $0x1], 0  ;;  %s814_s12 = smov 0   ;;  %s816_s13 = smov 0  }
   0x2   :  { %s818_s14 = smov 0   ;;  %s820_s15 = smov 0  }
   0x3   :  { %s822_s16 = smov 0   ;;  %s824_s17 = smov 0  }
   0x4 LB: > { %s531_s18 = sadd.s32 4294967295, %s782_s17   ;;  %s532_s19 = sadd.s32 4294967294, %s782_s17   ;;  %s782_s17 = sphi %s824_s17, %s16_s17   ;;  %s778_s16 = sphi %s822_s16, %s964_s16   ;;  %s774_s15 = sphi %s820_s15, %s963_s15   ;;  %s770_s14 = sphi %s818_s14, %s962_s14   ;;  %s766_s13 = sphi %s816_s13, %s961_s13   ;;  %s762_s12 = sphi %s814_s12, %s960_s12  }
   0x5   : > { %s25_s20 = sadd.s32 1, %s778_s16  ;;  %s63_s21 = sadd.s32 1, %s770_s14 }
   0x6   : > { %p26_p0 = scmp.ge.s32.totalorder %s25_s20, 2  ;;  %p70_p1 = scmp.ne.s32.totalorder %s770_s14, %s766_s13 }
   0x7   : > { %p71_p2 = scmp.eq.s32.totalorder %s782_s17, 0  ;;  %p130_p3 = scmp.eq.s32.totalorder %s531_s18, 1 }
   0x8   : > { %s966_s20 = smov (%p26_p0, %s25_s20), 0  ;;  %p135_p6 = scmp.ne.s32.totalorder %s766_s13, %s762_s12 }
   0x9   : > { %p853_p4 = por %p71_p2, %p70_p1  ;;  %p857_p5 = por %p130_p3, %p70_p1 }
   0xa   : > { %s59_s24 = ssub.s32 %s778_s16, %s966_s20  ;;  %p136_p8 = scmp.eq.s32.totalorder %s532_s19, 1 }
   0xb   : > { %p61_p7 = scmp.eq.s32.totalorder %s59_s24, 0  ;;  %p535_p10 = scmp.ge.s32.totalorder %s782_s17, 2 }
   0xc   : > { %p868_p9 = por %p136_p8, %p135_p6 }
   0xd   : > { %s866_s25 = scalar_select %p61_p7, %s770_s14, %s63_s21  }
   0xe   : > { %159 = sbr.rel (%p535_p10) target bundleno = 55 (0x37), region = 20 }
  0x15   : > { %162 = sbr.rel (!%p853_p4) target bundleno = 38 (0x26), region = 24  ;;  %s164_s27 = sand.u32 (%p853_p4), 1, %s770_s14  }
  0x16   : > { %s537_s28 = sshll.u32 (%p853_p4), %s778_s16, 1  ;;  %s536_s29 = sshll.u32 (%p853_p4), %s164_s27, 3 }
  0x17   : > { %s174_s5 = scalar_lea.vmem (%p853_p4), %s954_s1, %s537_s28   ;;  %s166_s6 = scalar_lea.vmem (%p853_p4), [#allocation2], %s536_s29  }
  0x18   : > { %s784_s7 = smov (%p853_p4), 0  }
  0x1c LB: >> { %v192_v0 = vld [vmem:[%s174_s5] sm:$0x3]  ;;  %s186_s7 = sadd.s32 1, %s786_s7   ;;  %s786_s7 = sphi %s784_s7, %s186_s7  }
  0x1d   : >> { %193 = vst [vmem:[%s166_s6] sm:$0x3] %v192_v0  ;;  %p185_p11 = scmp.ge.s32.totalorder %s186_s7, 1 }
  0x1f   : > { %188 = sbr.rel (!%p185_p11) target bundleno = 28 (0x1c), region = 151 }
  0x26 PF: > { %225 = sbr.rel (!%p853_p4) target bundleno = 55 (0x37), region = 58  ;;  %s227_s8 = sand.u32 (%p853_p4), 1, %s770_s14  }
  0x27   : > { %s541_s9 = sshll.u32 (%p853_p4), %s778_s16, 1  ;;  %s540_s10 = sshll.u32 (%p853_p4), %s227_s8, 3 }
  0x28   : > { %s237_s19 = scalar_lea.vmem (%p853_p4), %s955_s2, %s541_s9   ;;  %s229_s21 = scalar_lea.vmem (%p853_p4), [#allocation3], %s540_s10  }
  0x29   : > { %s788_s24 = smov (%p853_p4), 0  }
  0x2d LB: >> { %v255_v1 = vld [vmem:[%s237_s19] sm:$0x3]  ;;  %s249_s24 = sadd.s32 1, %s790_s24   ;;  %s790_s24 = sphi %s788_s24, %s249_s24  }
  0x2e   : >> { %256 = vst [vmem:[%s229_s21] sm:$0x3] %v255_v1  ;;  %p248_p12 = scmp.ge.s32.totalorder %s249_s24, 1 }
  0x30   : > { %251 = sbr.rel (!%p248_p12) target bundleno = 45 (0x2d), region = 162 }
  0x37 PF: > { %p544_p13 = scmp.ge.s32.totalorder %s782_s17, 1  ;;  %p287_p0 = scmp.lt.s32.totalorder %s782_s17, 3 }
  0x39   : > { %p288_p1 = pnand %p544_p13, %p287_p0 }
  0x3a   : > { %v355_v2 = vld [vmem:[%s953_s0] sm:$0xff] (!%p288_p1)  ;;  %v792_v3 = vmov (!%p288_p1), 0   ;;  %s895_s28 = sand.u32 (!%p288_p1), 1, %s766_s13   ;;  %v351_v9 = vlaneseq (!%p288_p1)  ;;  %s547_s5 = sshll.u32 (!%p288_p1), %s774_s15, 7 }
  0x3b   : > { %291 = sbr.rel (%p288_p1) target bundleno = 359 (0x167), region = 92  ;;  %671 = vset.pattern.permute.xlu0 (!%p288_p1), %v792_v3  ;;  %s545_s29 = sshll.u32 (!%p288_p1), %s895_s28, 3  ;;  %v353_v14 = vstv (!%p288_p1), %s547_s5 }
  0x3c   : > { %357 = vperm.xlu0 (!%p288_p1), %671, %v355_v2   ;;  %s296_s30 = scalar_lea.vmem (!%p288_p1), [#allocation2], %s545_s29  ;;  %s303_s4 = scalar_lea.vmem (!%p288_p1), [#allocation3], %s545_s29  ;;  %v352_v11 = vand.u32 (!%p288_p1), 127, %v351_v9 }
  0x3d   : > { %v341_v4 = vld [vmem:[%s296_s30] sm:$0xff] (!%p288_p1)  ;;  %v342_v5 = vld [vmem:[%s303_s4] sm:$0xff] (!%p288_p1)  ;;  %s330_s6 = scalar_lea.vmem (!%p288_p1), [#allocation4], %s895_s28  ;;  %s548_s8 = sshll.u32 (!%p288_p1), %s774_s15, 4 }
  0x3e   : > { %v343_v6 = vsub.f32 (!%p288_p1), %v342_v5, %v341_v4  ;;  %v354_v15 = vadd.s32 (!%p288_p1), %v353_v14, %v352_v11  ;;  %s387_s7 = sshll.u32 (!%p288_p1), %s330_s6, 4  ;;  %vm369_vm1 = vcmp.eq.s32.totalorder (!%p288_p1), %v352_v11, 0  ;;  %s904_s11 = scalar_lea.hbm (!%p288_p1), %s956_s3, %s548_s8  ;;  %s906_s7 = int_to_ptr.vmem [resolvable:$true] %s387_s7 }
  0x3f   : > { %s373_s18 = scalar_lea.sflag (!%p288_p1), [#allocation5], %s895_s28  ;;  %s672_s19 = scalar_lea.vmem (!%p288_p1), %s906_s7, 16 }
  0x40   : > { %v344_v7 = vand.u32 (!%p288_p1), 2147483647, %v343_v6  ;;  %p673_p2 = scmp.ne.s32.totalorder (!%p288_p1), %s906_s7, %s672_s19  ;;  %s793_s15 = smov (!%p288_p1), [#allocation4]  }
  0x41   : > { %s676_s21 = sshll.u32 (!%p288_p1), %s793_s15, 4  ;;  %s677_s21 = int_to_ptr.vmem [resolvable:$false] %s676_s21 }
  0x42   : > { %v345_v8 = vmin.f32 %v344_v7, 1.0  ;;  %p674_p3 = pnand %p673_p2, %p857_p5  ;;  %s678_s24 = scalar_lea.vmem %s677_s21, 32 }
  0x43   : > { %p679_p6 = scmp.lt.s32.totalorder %s906_s7, %s677_s21  ;;  %p680_p7 = scmp.lt.s32.totalorder %s678_s24, %s672_s19 }
  0x44   : > { %v346_v10 = vmul.f32 0.5, %v345_v8  ;;  %v348_v13 = vsub.f32 %v344_v7, %v345_v8  ;;  %p675_p4 = pneg %p674_p3 }
  0x45   : > { %p681_p8 = por %p680_p7, %p679_p6 }
  0x46   : > { %v347_v12 = vmul.f32 %v346_v10, %v345_v8 }
  0x47   : > { %p682_p11 = pnand %p681_p8, %p675_p4 }
  0x48   : > { %v349_v16 = vadd.f32 %v348_v13, %v347_v12 }
  0xbb   : > { %v358_v17 = vpop.permute.xlu0 %357 }
  0xbc   : > { %vm359_vm0 = vcmp.lt.s32.totalorder %v354_v15, %v358_v17 }
  0xbd   : > { %v360_v18 = vsel %vm359_vm0, %v349_v16, 0.0 }
  0xbe   : > { %v361_v19 = vrot.slane %v360_v18, 4 }
  0xc0   : > { %v362_v20 = vadd.f32 %v361_v19, %v360_v18 }
  0xc2   : > { %v363_v21 = vrot.slane %v362_v20, 2 }
  0xc4   : > { %v364_v22 = vadd.f32 %v363_v21, %v362_v20 }
  0xc6   : > { %v365_v23 = vrot.slane %v364_v22, 1 }
  0xc8   : > { %v366_v24 = vadd.f32 %v365_v23, %v364_v22 }
  0xca   : > { %367 = vadd.xlane.f32.xlu0 %v366_v24 }
 0x157   : > { %v368_v25 = vpop.xlane.xlu0 %367 }
 0x158   : > { %v370_v26 = vsel %vm369_vm1, %v368_v25, 0.0 }
 0x159   : > { %371 = vst [vmem:[%s330_s6] sm:$0x1] %v370_v26 }
 0x15a   : > { %685 = shalt.err (!%p682_p11)
}
 0x15b   : > { %s686_s22 = scalar_lea.hbm %s904_s11, 16  ;;  %s690_s29 = scalar_lea.hbm %s956_s3, 32 }
 0x15c   : > { %p687_p12 = scmp.ne.s32.totalorder %s904_s11, %s686_s22  ;;  %p691_p1 = scmp.lt.u32.totalorder %s904_s11, %s956_s3 }
 0x15d   : > { %p692_p2 = scmp.lt.u32.totalorder %s690_s29, %s686_s22  ;;  %p694_p4 = scmp.lt.u32.totalorder %s686_s22, %s904_s11 }
 0x15e   : > { %p688_p13 = pnand %p687_p12, %p857_p5 }
 0x15f   : > { %p693_p3 = por %p692_p2, %p691_p1 }
 0x160   : > { %p689_p0 = pneg %p688_p13 }
 0x161   : > { %p695_p6 = por %p694_p4, %p693_p3 }
 0x163   : > { %p696_p7 = pnand %p695_p6, %p689_p0 }
 0x165   : > { %699 = shalt.err (!%p696_p7)
}
 0x166   : > { %551 = dma.vmem_to_hbm [thread:$0]  (%p857_p5), %s906_s7, 16, %s904_s11, %s373_s18  }
 0x167 PF: > { %s399_s5 = sand.u32 1, %s762_s12   ;;  %p554_p8 = pnand %p535_p10, %p868_p9 }
 0x168   : > { %s400_s6 = scalar_lea.sflag [#allocation5], %s399_s5 }
 0x169   : > { %757 = dma.done.wait (!%p554_p8), %s400_s6, 16  }
 0x16a   : > { %759 = vsyncadd (!%p554_p8), %s400_s6, 4294967280  ;;  %s16_s17 = sadd.s32 1, %s782_s17   ;;  %s960_s12 = smov %s766_s13 }
 0x16b   : > { %p13_p11 = scmp.ge.s32.totalorder %s16_s17, 4   ;;  %s961_s13 = smov %s770_s14 }
 0x16c   : > { %s962_s14 = smov %s866_s25  ;;  %s963_s15 = smov %s778_s16 }
 0x16d   : > { %s964_s16 = smov %s966_s20  ;;  %15 = sbr.rel (!%p13_p11) target bundleno = 4 (0x4), region = 173 }
 0x174   :  { %404 = vsyncpa [#allocation5], 1 }
 0x175   :  { %406 = vsyncpa [#allocation5 + $0x1], 1 }

</bundles_post_ra>
